<compile_context>
chip_gen: v6e
topology: v6e:2x2x1
jax: 0.10.0
libtpu: 0.0.40
codegen_flags: <defaults>
</compile_context>

<pallas_src>
import jax
import jax.numpy as jnp
from jax import lax
from jax.experimental import pallas as pl
from jax.experimental.pallas import tpu as pltpu

SUM_DIMS = (0, 2)
KEEPDIM = False


# ----------------------------- tiling helpers ------------------------------

def _round_up(x, m):
    return ((x + m - 1) // m) * m


def _best_tile(dim, cap, unit):
    """Largest t dividing `dim` with t <= cap and (t % unit == 0 or t == dim)."""
    cap = min(cap, dim)
    if cap < 1:
        return None
    best = None
    d = 1
    while d * d <= dim:
        if dim % d == 0:
            for cand in (d, dim // d):
                if cand <= cap and (cand % unit == 0 or cand == dim):
                    if best is None or cand > best:
                        best = cand
        d += 1
    return best


def _vmem_capacity_bytes():
    try:
        info = pltpu.get_tpu_info()
        cap = getattr(info, "vmem_capacity_bytes", None)
        if cap:
            return int(cap)
    except Exception:
        pass
    return 64 * 1024 * 1024  # conservative default: v7x has the smallest VMEM


def _block_bytes(B, ts, tk):
    """Double-buffered VMEM footprint of the x / w_sum / output blocks (f32)."""
    x_b = 2 * B * _round_up(ts, 8) * _round_up(tk, 128) * 4
    w_b = 2 * 8 * _round_up(tk, 128) * 4          # (1, tk) block, sublane-padded
    o_b = 2 * 8 * _round_up(ts, 128) * 4          # (1, ts) block
    return x_b + w_b + o_b


def _choose_tiles(B, S, K, budget):
    # Prefer tk == K: removes the reduction grid axis and the output revisit,
    # and makes each x DMA fully contiguous per (b, s-range).
    ts_cap = budget // max(1, 2 * B * _round_up(K, 128) * 4)
    if S >= 256:                      # keep >= 2 parallel blocks for 2-TC chips
        ts_cap = min(ts_cap, S // 2)
    ts = _best_tile(S, ts_cap, 128)
    if ts is not None and _block_bytes(B, ts, K) <= budget:
        return ts, K

    # Fall back to tiling K (accumulate across an 'arbitrary' grid axis).
    ts_min = S if S <= 128 else 128
    tk = _best_tile(K, budget // max(1, 2 * B * _round_up(ts_min, 8) * 4), 128) or K
    ts_cap = budget // max(1, 2 * B * _round_up(tk, 128) * 4)
    if S >= 256:
        ts_cap = min(ts_cap, S // 2)
    ts = _best_tile(S, ts_cap, 128) or ts_min
    return ts, tk


def _validate_tile(dim, t, unit, name):
    if dim % t != 0:
        raise ValueError(f"{name}={t} must divide {dim}")
    if t % unit != 0 and t != dim:
        raise ValueError(
            f"{name}={t} must be a multiple of {unit} or equal the full dim {dim}")


# --------------------------------- kernel ----------------------------------

def _make_kernel(B, single_k_step, unroll):
    def kernel(x_ref, w_ref, o_ref):
        # x_ref: (B, ts, tk)   w_ref: (1, tk)   o_ref: (1, ts)
        w = w_ref[...]                                       # (1, tk)

        def body(b, acc):
            # (1, tk) . (ts, tk)^T -> (1, ts).  rhs contracting on its lane dim
            # is the native Q.K^T MXU pattern: x tile streams straight to the
            # MXU, the accumulator stays lane-dense (ts/128 vregs).
            return acc + lax.dot_general(
                w, x_ref[b],
                dimension_numbers=(((1,), (1,)), ((), ())),
                preferred_element_type=jnp.float32)

        acc = lax.fori_loop(0, B, body,
                            jnp.zeros(o_ref.shape, jnp.float32),
                            unroll=unroll)

        if single_k_step:
            o_ref[...] = acc.astype(o_ref.dtype)
        else:
            @pl.when(pl.program_id(1) == 0)
            def _init():
                o_ref[...] = jnp.zeros_like(o_ref)
            o_ref[...] += acc.astype(o_ref.dtype)

    return kernel


# -------------------------------- wrapper -----------------------------------

def linear_sum(x, other, *, ts=None, tk=None):
    """x: (B, S, K), other: (N, K) -> (S,) float32.

    Equivalent to torch.sum(F.linear(x, other), (0, 2), keepdim=False).
    """
    B, S, K = x.shape
    N, K2 = other.shape
    assert K == K2, (K, K2)
    x = x.astype(jnp.float32)

    # Perf item 1: pre-reduce `other` over N in the wrapper (tiny vs streaming x).
    w_sum = jnp.sum(other.astype(jnp.float32), axis=0).reshape(1, K)

    phys = _vmem_capacity_bytes()
    budget = int(phys * 0.70)

    auto_ts, auto_tk = _choose_tiles(B, S, K, budget)
    if ts is None:
        ts = auto_ts
    if tk is None:
        tk = auto_tk
    _validate_tile(S, ts, 128, "ts")
    _validate_tile(K, tk, 128, "tk")

    single_k = (tk == K)
    kernel = _make_kernel(B, single_k, unroll=(B <= 8))

    need = _block_bytes(B, ts, tk)
    vmem_limit = int(min(phys * 0.95, max(need + (4 << 20), 32 << 20)))

    if single_k:
        grid = (S // ts,)
        in_specs = [
            pl.BlockSpec((B, ts, K), lambda si: (0, si, 0)),
            pl.BlockSpec((1, K), lambda si: (0, 0)),
        ]
        out_specs = pl.BlockSpec((1, ts), lambda si: (0, si))
        dims = ("parallel",)
    else:
        grid = (S // ts, K // tk)
        in_specs = [
            pl.BlockSpec((B, ts, tk), lambda si, ki: (0, si, ki)),
            pl.BlockSpec((1, tk), lambda si, ki: (0, ki)),
        ]
        out_specs = pl.BlockSpec((1, ts), lambda si, ki: (0, si))
        dims = ("parallel", "arbitrary")

    out2d = pl.pallas_call(
        kernel,
        out_shape=jax.ShapeDtypeStruct((1, S), jnp.float32),
        grid_spec=pltpu.PrefetchScalarGridSpec(
            num_scalar_prefetch=0,
            grid=grid,
            in_specs=in_specs,
            out_specs=out_specs,
        ),
        compiler_params=pltpu.CompilerParams(
            dimension_semantics=dims,
            vmem_limit_bytes=vmem_limit,
        ),
    )(x, w_sum)

    result = out2d[0]                     # (S,)
    if KEEPDIM:
        result = result.reshape(1, S, 1)
    return result


# ---------------------------------- test ------------------------------------

if __name__ == "__main__":
    key = jax.random.PRNGKey(0)
    kx, kw, kx2, kw2 = jax.random.split(key, 4)

    # Reference-config shapes: input (B, S, K) = (2, 8, 32), other (N, K) = (64, 32)
    B, S, K, N = 2, 8, 32, 64
    x = jax.random.normal(kx, (B, S, K), dtype=jnp.float32)
    other = jax.random.normal(kw, (N, K), dtype=jnp.float32)
    out = jax.block_until_ready(linear_sum(x, other))
    ref = jnp.sum(jnp.einsum("bsk,nk->bsn", x, other, precision="highest"),
                  axis=SUM_DIMS)
    assert out.shape == ref.shape, (out.shape, ref.shape)
    assert jnp.allclose(out, ref, rtol=1e-4, atol=1e-3), "mismatch (small)"

    # Larger case: exercises the multi-block parallel S axis (full-K path).
    B2, S2, K2, N2 = 2, 256, 512, 16
    x2 = jax.random.normal(kx2, (B2, S2, K2), dtype=jnp.float32)
    other2 = jax.random.normal(kw2, (N2, K2), dtype=jnp.float32)
    ref2 = jnp.sum(jnp.einsum("bsk,nk->bsn", x2, other2, precision="highest"),
                   axis=SUM_DIMS)
    tol2 = float(3e-4 * jnp.max(jnp.abs(ref2)) + 3e-2)

    out2 = jax.block_until_ready(linear_sum(x2, other2))
    assert out2.shape == ref2.shape, (out2.shape, ref2.shape)
    err2 = float(jnp.max(jnp.abs(out2 - ref2)))
    assert err2 <= tol2, f"mismatch (tiled): {err2} > {tol2}"

    # Forced K-tiling: exercises the accumulate-over-ki kernel variant.
    out3 = jax.block_until_ready(linear_sum(x2, other2, ts=128, tk=256))
    err3 = float(jnp.max(jnp.abs(out3 - ref2)))
    assert err3 <= tol2, f"mismatch (k-tiled): {err3} > {tol2}"

    print("KERNEL_OK")
</pallas_src>

<mosaic_0001>
module attributes {stable_mosaic.version = 11 : i64} {
  func.func @kernel(%arg0: i32, %arg1: memref<2x8x32xf32, #tpu.memory_space<vmem>>, %arg2: memref<1x32xf32, #tpu.memory_space<vmem>>, %arg3: memref<1x8xf32, #tpu.memory_space<vmem>>) attributes {dimension_semantics = [#tpu.dimension_semantics<parallel>], iteration_bounds = array<i64: 1>, scalar_prefetch = 0 : i64, scratch_operands = 0 : i64, tpu.core_type = #tpu.core_type<tc>, window_params = [{transform_indices = @transform_0, window_bounds = array<i64: 2, 8, 32>}, {pipeline_mode = #tpu.pipeline_mode<synchronous>, transform_indices = @transform_1, window_bounds = array<i64: 1, 32>}, {transform_indices = @transform_2, window_bounds = array<i64: 1, 8>}]} {
    %c0 = arith.constant 0 : index
    %c0_0 = arith.constant 0 : index
    %0 = vector.load %arg2[%c0, %c0_0] : memref<1x32xf32, #tpu.memory_space<vmem>>, vector<1x32xf32>
    %cst = arith.constant 0.000000e+00 : f32
    %1 = vector.broadcast %cst : f32 to vector<1x8xf32>
    %c0_i32 = arith.constant 0 : i32
    %2 = arith.index_cast %c0_i32 : i32 to index
    %c0_1 = arith.constant 0 : index
    %c0_2 = arith.constant 0 : index
    %3 = vector.load %arg1[%2, %c0_1, %c0_2] : memref<2x8x32xf32, #tpu.memory_space<vmem>>, vector<1x8x32xf32>
    %4 = vector.shape_cast %3 : vector<1x8x32xf32> to vector<8x32xf32>
    %cst_3 = arith.constant dense<0.000000e+00> : vector<1x8xf32>
    %5 = tpu.matmul %0, %4, %cst_3 {dimension_numbers = #tpu.dot_dimension_numbers<[1], [1], [0], [0], [0, 0, 1, 0], [], []>} : vector<1x32xf32>, vector<8x32xf32>, vector<1x8xf32> -> vector<1x8xf32>
    %6 = arith.addf %1, %5 : vector<1x8xf32>
    %c1_i32 = arith.constant 1 : i32
    %7 = arith.index_cast %c1_i32 : i32 to index
    %c0_4 = arith.constant 0 : index
    %c0_5 = arith.constant 0 : index
    %8 = vector.load %arg1[%7, %c0_4, %c0_5] : memref<2x8x32xf32, #tpu.memory_space<vmem>>, vector<1x8x32xf32>
    %9 = vector.shape_cast %8 : vector<1x8x32xf32> to vector<8x32xf32>
    %cst_6 = arith.constant dense<0.000000e+00> : vector<1x8xf32>
    %10 = tpu.matmul %0, %9, %cst_6 {dimension_numbers = #tpu.dot_dimension_numbers<[1], [1], [0], [0], [0, 0, 1, 0], [], []>} : vector<1x32xf32>, vector<8x32xf32>, vector<1x8xf32> -> vector<1x8xf32>
    %11 = arith.addf %6, %10 : vector<1x8xf32>
    %c2_i32 = arith.constant 2 : i32
    %c0_7 = arith.constant 0 : index
    %c0_8 = arith.constant 0 : index
    %12 = vector.load %arg3[%c0_7, %c0_8] : memref<1x8xf32, #tpu.memory_space<vmem>>, vector<1x8xf32>
    tpu.vector_store %arg3[%c0_7, %c0_8], %11 {strides = array<i32>} : memref<1x8xf32, #tpu.memory_space<vmem>>, vector<1x8xf32>,
    return
  }
  func.func @transform_0(%arg0: i32) -> (i32, i32, i32) {
    %c0_i32 = arith.constant 0 : i32
    %c0_i32_0 = arith.constant 0 : i32
    %c0_i32_1 = arith.constant 0 : i32
    return %c0_i32, %arg0, %c0_i32_0 : i32, i32, i32
  }
  func.func @transform_1(%arg0: i32) -> (i32, i32) {
    %c0_i32 = arith.constant 0 : i32
    %c0_i32_0 = arith.constant 0 : i32
    %c0_i32_1 = arith.constant 0 : i32
    return %c0_i32, %c0_i32_0 : i32, i32
  }
  func.func @transform_2(%arg0: i32) -> (i32, i32) {
    %c0_i32 = arith.constant 0 : i32
    %c0_i32_0 = arith.constant 0 : i32
    return %c0_i32, %arg0 : i32, i32
  }
}

</mosaic_0001>

<bundles_post_ra>
// kernel: tpu_custom_call.1
= control target key start
LH: loop header
LB: loop body
LE: loop exit
PB: predicated region body
PF: predicated region fallthrough
CT: control target
= control target key end

     0   :  { %7 = vsyncpa [#allocation3], 0  ;;  %s295_s0 = inlined_call_operand.hbm [shape: f32[2,8,32], index: 0, kind: input, shape index: {}]   ;;  %s296_s1 = inlined_call_operand.vmem [shape: f32[1,32], index: 1, kind: input, shape index: {}]   ;;  %s297_s2 = inlined_call_operand.hbm [shape: f32[1,8], index: 2, kind: output, shape index: {}]  }
   0x1   :  { %8 = vsyncpa [#allocation4], 0  ;;  %s265_s9 = smov [#allocation2]  }
   0x2   :  { %s14_s10 = sshll.u32 %s265_s9, 4  ;;  %s15_s10 = int_to_ptr.vmem [resolvable:$true] %s14_s10 }
   0x3   :  { %s229_s11 = scalar_lea.vmem %s15_s10, 256  ;;  %p234_p1 = scmp.lt.s32.totalorder %s15_s10, %s15_s10 }
   0x4   :  { %p230_p0 = scmp.ne.s32.totalorder %s15_s10, %s229_s11  ;;  %p235_p2 = scmp.lt.s32.totalorder %s229_s11, %s229_s11 }
   0x6   :  { %p236_p3 = por %p235_p2, %p234_p1 }
   0x8   :  { %p237_p4 = pnand %p236_p3, %p230_p0 }
   0xa   :  { %240 = shalt.err (!%p237_p4)
}
   0xb   :  { %s266_s12 = smov 128   ;;  %s267_s13 = smov 8  }
   0xc   :  { %20 = dma.hbm_to_vmem [thread:$0]  %s295_s0, 256, %s15_s10, [#allocation3], %s266_s12, %s266_s12, %s267_s13  }
   0xd   :  { %261 = dma.done.wait [#allocation3], 256  }
   0xe   :  { %262 = vsyncadd [#allocation3], 4294967040  ;;  %v268_v0 = vmov 0.0   ;;  %vm269_vm0 = vmmov 0   ;;  %vm30_vm1 = vcmask 261120   ;;  %v29_v1 = vld [vmem:[#allocation2 + $0x8] sm:$0xff] }
   0xf   :  { %205 = vmatprep.subr.mxu0 %v268_v0  ;;  %210 = vmatprep.subr.mxu1 %v268_v0  ;;  %v27_v2 = vld [vmem:[#allocation2] sm:$0xff]  ;;  %s270_s0 = smov [#allocation5]   ;;  %vm180_vm2 = vcmask 57344  }
  0x10   :  { %207 = vmatprep.mubr.msk.f32.mxu0 %vm269_vm0, %v268_v0  ;;  %212 = vmatprep.mubr.msk.f32.mxu1 %vm269_vm0, %v268_v0  ;;  %v26_v3 = vld [vmem:[%s296_s1] sm:$0x1]  ;;  %s188_s18 = sshll.u32 %s270_s0, 4  ;;  %s189_s18 = int_to_ptr.vmem [resolvable:$true] %s188_s18 }
  0x11   :  { %206 = vmatpush3.xpose.msk.msra.mxu0 %vm30_vm1, %v29_v1  ;;  %211 = vmatpush3.xpose.msk.msra.mxu1 %vm30_vm1, %v27_v2  ;;  %s241_s19 = scalar_lea.vmem %s189_s18, 16  ;;  %s245_s20 = scalar_lea.vmem %s189_s18, 32 }
  0x12   :  { %p242_p5 = scmp.ne.s32.totalorder %s189_s18, %s241_s19  ;;  %p246_p6 = scmp.lt.s32.totalorder %s189_s18, %s189_s18 }
  0x13   :  { %p247_p7 = scmp.lt.s32.totalorder %s245_s20, %s241_s19 }
  0x14   :  { %208 = vmatmul.mubr.msk.f32.vlgmr.msra.gmra.mxu0 %vm30_vm1, %v26_v3  ;;  %213 = vmatmul.mubr.msk.f32.vlgmr.msra.gmra.mxu1 %vm30_vm1, %v26_v3 }
  0x15   :  { %p248_p8 = por %p247_p7, %p246_p6 }
  0x17   :  { %p249_p9 = pnand %p248_p8, %p242_p5 }
  0xd4   :  { %v103_v4 = vpop.f32.mrf.mxu0  ;;  %v176_v5 = vpop.f32.mrf.mxu1 }
  0xd5   :  { %v177_v6 = vadd.f32 %v176_v5, %v103_v4 }
  0xd6   :  { %v209_v7 = vpop.f32.mrf.mxu0  ;;  %v214_v8 = vpop.f32.mrf.mxu1 }
  0xd7   :  { %181 = vst.msk [vmem:[#allocation5] sm:$0x1] %vm180_vm2, %v177_v6 }
  0xd8   :  { %252 = shalt.err (!%p249_p9)
}
  0xd9   :  { %191 = dma.vmem_to_hbm [thread:$0]  %s189_s18, 16, %s297_s2, [#allocation4]  }
  0xda   :  { %263 = dma.done.wait [#allocation4], 16  }
  0xdb   :  { %264 = vsyncadd [#allocation4], 4294967280 }
  0xdc   :  { %195 = vsyncpa [#allocation3], 1 }
  0xdd   :  { %196 = vsyncpa [#allocation4], 1 }

</bundles_post_ra>
